<compile_context>
chip_gen: v7x
topology: tpu7x:2x2x1
jax: 0.10.0
libtpu: 0.0.40
codegen_flags: <defaults>
</compile_context>

<pallas_src>
import jax
import jax.numpy as jnp
from jax import lax
from jax.experimental import pallas as pl
from jax.experimental.pallas import tpu as pltpu


def _pctr_kernel(cand_ref, hist_ref, item_tab_ref, cate_tab_ref, out_ref):
    """One batch tile; the batch index lives on the lane (last) axis.

    cand_ref:     (2, Bt)   int32  row 0 = item id, row 1 = cate id
    hist_ref:     (2T, Bt)  int32  rows [0,T) hist item ids, [T,2T) hist cate ids
    item_tab_ref: (Dh+1, Vi) f32   transposed item table, last row = item_bias
    cate_tab_ref: (Dh, Vc)   f32   transposed cate table
    out_ref:      (1, Bt)    f32   sigmoid(logit), lane-dense
    """
    f32 = jnp.float32
    Bt = out_ref.shape[1]
    T = hist_ref.shape[0] // 2
    Vi = item_tab_ref.shape[1]
    Dh, Vc = cate_tab_ref.shape

    iota_i = lax.broadcasted_iota(jnp.int32, (Vi, Bt), 0)
    iota_c = lax.broadcasted_iota(jnp.int32, (Vc, Bt), 0)

    cand = cand_ref[...]                                   # (2, Bt)
    onehot_i = (iota_i == cand[0:1, :]).astype(f32)        # (Vi, Bt)
    onehot_c = (iota_c == cand[1:2, :]).astype(f32)        # (Vc, Bt)

    # History count matrices: counts[v, b] = #{t : hist[t, b] == v}.
    hist = hist_ref[...]                                   # (2T, Bt)
    counts_i = jnp.zeros((Vi, Bt), f32)
    counts_c = jnp.zeros((Vc, Bt), f32)
    for t in range(T):  # static unroll; T is a trace-time constant
        counts_i = counts_i + (iota_i == hist[t:t + 1, :]).astype(f32)
        counts_c = counts_c + (iota_c == hist[T + t:T + t + 1, :]).astype(f32)

    item_tab = item_tab_ref[...]                           # (Dh+1, Vi)
    cate_tab = cate_tab_ref[...]                           # (Dh, Vc)

    # MXU "gathers": columns = batch elements.
    cand_i = jnp.dot(item_tab, onehot_i, preferred_element_type=f32)  # (Dh+1, Bt)
    cand_c = jnp.dot(cate_tab, onehot_c, preferred_element_type=f32)  # (Dh, Bt)
    hist_i = jnp.dot(item_tab, counts_i, preferred_element_type=f32)  # (Dh+1, Bt)
    hist_c = jnp.dot(cate_tab, counts_c, preferred_element_type=f32)  # (Dh, Bt)

    item_emb = cand_i[:Dh, :]                              # candidate item half
    bias = cand_i[Dh:Dh + 1, :]                            # folded item_bias[item]

    # TODO(synk): `_user_forward` is abstract in the PyTorch base class; mean
    # pooling of hist_emb is used as a stand-in (neg_hist_item / attention unused).
    # TODO(synk): `_wide_forward` is abstract; inner-product stand-in (split
    # halves == dot over the concatenated embedding).
    # TODO(synk): `_deep_forward` is abstract; contributes zero.
    inv_t = 1.0 / T
    wide = (jnp.sum(hist_i[:Dh, :] * item_emb, axis=0, keepdims=True)
            + jnp.sum(hist_c * cand_c, axis=0, keepdims=True)) * inv_t

    out_ref[...] = jax.nn.sigmoid(bias + wide)             # (1, Bt), unmasked store


def pctr_forward(item, hist_item, neg_hist_item, cate_list,
                 item_emb_w, cate_emb_w, item_bias, *, batch_tile=128):
    """item: (B,) int, hist_item/neg_hist_item: (B, T) int; returns (B, 1) f32."""
    del neg_hist_item   # only consumed by the abstract `_user_forward`
    B, T = hist_item.shape
    Vi, Dh = item_emb_w.shape
    Vc = cate_emb_w.shape[0]

    Bp = pl.cdiv(B, batch_tile) * batch_tile
    pad = Bp - B

    item32 = item.astype(jnp.int32)
    hist32 = hist_item.astype(jnp.int32)
    cl32 = cate_list.astype(jnp.int32)

    # Category indirection hoisted out of the kernel (plain XLA gathers).
    cate32 = cl32[item32]                     # (B,)
    hist_cate32 = cl32[hist32]                # (B, T)

    # Batch goes on the lane (last) axis; pad it up to a tile multiple.
    cand = jnp.pad(jnp.stack([item32, cate32], axis=0), ((0, 0), (0, pad)))
    hist_pack = jnp.pad(
        jnp.concatenate([hist32.T, hist_cate32.T], axis=0), ((0, 0), (0, pad)))

    # Transposed tables (rows = embedding dims); item_bias folded as last row.
    # TODO(synk): bf16 storage / HBM + manual-DMA gathers for production vocab.
    item_tab_t = jnp.concatenate(
        [item_emb_w.astype(jnp.float32), item_bias.astype(jnp.float32)],
        axis=1).T                                            # (Dh + 1, Vi)
    cate_tab_t = cate_emb_w.astype(jnp.float32).T            # (Dh, Vc)

    grid = (Bp // batch_tile,)
    cost = pl.CostEstimate(
        flops=int(2 * Bp * (2 * (Dh + 1) * Vi + 2 * Dh * Vc)
                  + Bp * (2 * T + 2) * (Vi + Vc)),
        transcendentals=int(Bp),
        bytes_accessed=int(4 * (cand.size + hist_pack.size
                                + item_tab_t.size + cate_tab_t.size + Bp)),
    )

    out = pl.pallas_call(
        _pctr_kernel,
        out_shape=jax.ShapeDtypeStruct((1, Bp), jnp.float32),
        grid=grid,
        in_specs=[
            pl.BlockSpec((2, batch_tile), lambda b: (0, b)),
            pl.BlockSpec((2 * T, batch_tile), lambda b: (0, b)),
            # Constant block index -> tables DMA'd once, stay VMEM-resident.
            pl.BlockSpec((Dh + 1, Vi), lambda b: (0, 0)),
            pl.BlockSpec((Dh, Vc), lambda b: (0, 0)),
        ],
        out_specs=pl.BlockSpec((1, batch_tile), lambda b: (0, b)),
        compiler_params=pltpu.CompilerParams(
            dimension_semantics=("parallel",)),
        cost_estimate=cost,
    )(cand, hist_pack, item_tab_t, cate_tab_t)

    return out[0, :B].reshape(B, 1)


def _reference(item, hist_item, cate_list, item_emb_w, cate_emb_w, item_bias):
    cate = cate_list[item]
    hist_cate = cate_list[hist_item]
    item_emb = jnp.concatenate([item_emb_w[item], cate_emb_w[cate]], axis=1)
    hist_emb = jnp.concatenate([item_emb_w[hist_item], cate_emb_w[hist_cate]],
                               axis=2)
    user_emb = jnp.mean(hist_emb, axis=1)
    wide = jnp.sum(user_emb * item_emb, axis=1, keepdims=True)
    bias = item_bias[item]
    return jax.nn.sigmoid(bias + wide)


if __name__ == "__main__":
    # Small deterministic setup.  B > batch_tile so the grid has >= 2 steps
    # (exercises the parallel batch-tile axis and the padded tail).
    item_count = 63     # item vocab rows = item_count + 1 = 64
    cate_count = 15     # cate vocab rows = cate_count + 1 = 16
    emb_dim = 32        # each table has emb_dim // 2 = 16 columns
    B, T = 200, 8

    key = jax.random.PRNGKey(0)
    k1, k2, k3, k4, k5, k6, k7 = jax.random.split(key, 7)

    # Parameters (nn.Embedding with padding_idx -> zero that row).
    item_emb_w = jax.random.normal(k1, (item_count + 1, emb_dim // 2),
                                   jnp.float32) * 0.1
    item_emb_w = item_emb_w.at[item_count].set(0.0)
    cate_emb_w = jax.random.normal(k2, (cate_count + 1, emb_dim // 2),
                                   jnp.float32) * 0.1
    cate_emb_w = cate_emb_w.at[cate_count].set(0.0)
    # PyTorch inits item_bias to zeros; random here so the bias path is exercised.
    item_bias = jax.random.normal(k7, (item_count + 1, 1), jnp.float32) * 0.1

    # cate_list maps item id -> category id (last entry is cate_count).
    cate_list = jax.random.randint(k3, (item_count,), 0, cate_count, jnp.int32)
    cate_list = jnp.concatenate(
        [cate_list, jnp.array([cate_count], jnp.int32)])

    # Inputs (x = (user, item, hist_item, neg_hist_item)).
    item = jax.random.randint(k4, (B,), 0, item_count, jnp.int32)
    hist_item = jax.random.randint(k5, (B, T), 0, item_count, jnp.int32)
    neg_hist_item = jax.random.randint(k6, (B, T), 0, item_count, jnp.int32)

    out = pctr_forward(item, hist_item, neg_hist_item, cate_list,
                       item_emb_w, cate_emb_w, item_bias)
    out = jax.block_until_ready(out)

    ref = _reference(item, hist_item, cate_list, item_emb_w, cate_emb_w,
                     item_bias)
    assert out.shape == (B, 1)
    # Tolerance sized for MXU f32 multi-pass rounding (reference is exact-gather
    # f32); real gather/pooling bugs produce errors orders of magnitude larger.
    assert jnp.allclose(out, ref, rtol=1e-3, atol=1e-3), (out, ref)
    print("KERNEL_OK")
</pallas_src>

<mosaic_0001>
module attributes {stable_mosaic.version = 11 : i64} {
  func.func @_pctr_kernel(%arg0: i32, %arg1: memref<2x128xi32, #tpu.memory_space<vmem>>, %arg2: memref<16x128xi32, #tpu.memory_space<vmem>>, %arg3: memref<17x64xf32, #tpu.memory_space<vmem>>, %arg4: memref<16x16xf32, #tpu.memory_space<vmem>>, %arg5: memref<1x128xf32, #tpu.memory_space<vmem>>) attributes {dimension_semantics = [#tpu.dimension_semantics<parallel>], iteration_bounds = array<i64: 2>, scalar_prefetch = 0 : i64, scratch_operands = 0 : i64, tpu.core_type = #tpu.core_type<tc>, window_params = [{transform_indices = @transform_0, window_bounds = array<i64: 2, 128>}, {transform_indices = @transform_1, window_bounds = array<i64: 16, 128>}, {pipeline_mode = #tpu.pipeline_mode<synchronous>, transform_indices = @transform_2, window_bounds = array<i64: 17, 64>}, {pipeline_mode = #tpu.pipeline_mode<synchronous>, transform_indices = @transform_3, window_bounds = array<i64: 16, 16>}, {transform_indices = @transform_4, window_bounds = array<i64: 1, 128>}]} {
    %0 = tpu.iota {dimensions = array<i32: 0>} : vector<64x128xi32>
    %1 = tpu.iota {dimensions = array<i32: 0>} : vector<16x128xi32>
    %c0 = arith.constant 0 : index
    %c0_0 = arith.constant 0 : index
    %2 = vector.load %arg1[%c0, %c0_0] : memref<2x128xi32, #tpu.memory_space<vmem>>, vector<2x128xi32>
    %3 = vector.extract_strided_slice %2 {offsets = [0, 0], sizes = [1, 128], strides = [1, 1]} : vector<2x128xi32> to vector<1x128xi32>
    %4 = vector.broadcast %3 : vector<1x128xi32> to vector<64x128xi32>
    %5 = arith.cmpi eq, %0, %4 : vector<64x128xi32>
    %6 = arith.extui %5 : vector<64x128xi1> to vector<64x128xi32>
    %7 = arith.sitofp %6 : vector<64x128xi32> to vector<64x128xf32>
    %8 = vector.extract_strided_slice %2 {offsets = [1, 0], sizes = [1, 128], strides = [1, 1]} : vector<2x128xi32> to vector<1x128xi32>
    %9 = vector.broadcast %8 : vector<1x128xi32> to vector<16x128xi32>
    %10 = arith.cmpi eq, %1, %9 : vector<16x128xi32>
    %11 = arith.extui %10 : vector<16x128xi1> to vector<16x128xi32>
    %12 = arith.sitofp %11 : vector<16x128xi32> to vector<16x128xf32>
    %c0_1 = arith.constant 0 : index
    %c0_2 = arith.constant 0 : index
    %13 = vector.load %arg2[%c0_1, %c0_2] : memref<16x128xi32, #tpu.memory_space<vmem>>, vector<16x128xi32>
    %cst = arith.constant 0.000000e+00 : f32
    %14 = vector.broadcast %cst : f32 to vector<64x128xf32>
    %cst_3 = arith.constant 0.000000e+00 : f32
    %15 = vector.broadcast %cst_3 : f32 to vector<16x128xf32>
    %16 = vector.extract_strided_slice %13 {offsets = [0, 0], sizes = [1, 128], strides = [1, 1]} : vector<16x128xi32> to vector<1x128xi32>
    %17 = vector.broadcast %16 : vector<1x128xi32> to vector<64x128xi32>
    %18 = arith.cmpi eq, %0, %17 : vector<64x128xi32>
    %19 = arith.extui %18 : vector<64x128xi1> to vector<64x128xi32>
    %20 = arith.sitofp %19 : vector<64x128xi32> to vector<64x128xf32>
    %21 = arith.addf %14, %20 : vector<64x128xf32>
    %22 = vector.extract_strided_slice %13 {offsets = [8, 0], sizes = [1, 128], strides = [1, 1]} : vector<16x128xi32> to vector<1x128xi32>
    %23 = vector.broadcast %22 : vector<1x128xi32> to vector<16x128xi32>
    %24 = arith.cmpi eq, %1, %23 : vector<16x128xi32>
    %25 = arith.extui %24 : vector<16x128xi1> to vector<16x128xi32>
    %26 = arith.sitofp %25 : vector<16x128xi32> to vector<16x128xf32>
    %27 = arith.addf %15, %26 : vector<16x128xf32>
    %28 = vector.extract_strided_slice %13 {offsets = [1, 0], sizes = [1, 128], strides = [1, 1]} : vector<16x128xi32> to vector<1x128xi32>
    %29 = vector.broadcast %28 : vector<1x128xi32> to vector<64x128xi32>
    %30 = arith.cmpi eq, %0, %29 : vector<64x128xi32>
    %31 = arith.extui %30 : vector<64x128xi1> to vector<64x128xi32>
    %32 = arith.sitofp %31 : vector<64x128xi32> to vector<64x128xf32>
    %33 = arith.addf %21, %32 : vector<64x128xf32>
    %34 = vector.extract_strided_slice %13 {offsets = [9, 0], sizes = [1, 128], strides = [1, 1]} : vector<16x128xi32> to vector<1x128xi32>
    %35 = vector.broadcast %34 : vector<1x128xi32> to vector<16x128xi32>
    %36 = arith.cmpi eq, %1, %35 : vector<16x128xi32>
    %37 = arith.extui %36 : vector<16x128xi1> to vector<16x128xi32>
    %38 = arith.sitofp %37 : vector<16x128xi32> to vector<16x128xf32>
    %39 = arith.addf %27, %38 : vector<16x128xf32>
    %40 = vector.extract_strided_slice %13 {offsets = [2, 0], sizes = [1, 128], strides = [1, 1]} : vector<16x128xi32> to vector<1x128xi32>
    %41 = vector.broadcast %40 : vector<1x128xi32> to vector<64x128xi32>
    %42 = arith.cmpi eq, %0, %41 : vector<64x128xi32>
    %43 = arith.extui %42 : vector<64x128xi1> to vector<64x128xi32>
    %44 = arith.sitofp %43 : vector<64x128xi32> to vector<64x128xf32>
    %45 = arith.addf %33, %44 : vector<64x128xf32>
    %46 = vector.extract_strided_slice %13 {offsets = [10, 0], sizes = [1, 128], strides = [1, 1]} : vector<16x128xi32> to vector<1x128xi32>
    %47 = vector.broadcast %46 : vector<1x128xi32> to vector<16x128xi32>
    %48 = arith.cmpi eq, %1, %47 : vector<16x128xi32>
    %49 = arith.extui %48 : vector<16x128xi1> to vector<16x128xi32>
    %50 = arith.sitofp %49 : vector<16x128xi32> to vector<16x128xf32>
    %51 = arith.addf %39, %50 : vector<16x128xf32>
    %52 = vector.extract_strided_slice %13 {offsets = [3, 0], sizes = [1, 128], strides = [1, 1]} : vector<16x128xi32> to vector<1x128xi32>
    %53 = vector.broadcast %52 : vector<1x128xi32> to vector<64x128xi32>
    %54 = arith.cmpi eq, %0, %53 : vector<64x128xi32>
    %55 = arith.extui %54 : vector<64x128xi1> to vector<64x128xi32>
    %56 = arith.sitofp %55 : vector<64x128xi32> to vector<64x128xf32>
    %57 = arith.addf %45, %56 : vector<64x128xf32>
    %58 = vector.extract_strided_slice %13 {offsets = [11, 0], sizes = [1, 128], strides = [1, 1]} : vector<16x128xi32> to vector<1x128xi32>
    %59 = vector.broadcast %58 : vector<1x128xi32> to vector<16x128xi32>
    %60 = arith.cmpi eq, %1, %59 : vector<16x128xi32>
    %61 = arith.extui %60 : vector<16x128xi1> to vector<16x128xi32>
    %62 = arith.sitofp %61 : vector<16x128xi32> to vector<16x128xf32>
    %63 = arith.addf %51, %62 : vector<16x128xf32>
    %64 = vector.extract_strided_slice %13 {offsets = [4, 0], sizes = [1, 128], strides = [1, 1]} : vector<16x128xi32> to vector<1x128xi32>
    %65 = vector.broadcast %64 : vector<1x128xi32> to vector<64x128xi32>
    %66 = arith.cmpi eq, %0, %65 : vector<64x128xi32>
    %67 = arith.extui %66 : vector<64x128xi1> to vector<64x128xi32>
    %68 = arith.sitofp %67 : vector<64x128xi32> to vector<64x128xf32>
    %69 = arith.addf %57, %68 : vector<64x128xf32>
    %70 = vector.extract_strided_slice %13 {offsets = [12, 0], sizes = [1, 128], strides = [1, 1]} : vector<16x128xi32> to vector<1x128xi32>
    %71 = vector.broadcast %70 : vector<1x128xi32> to vector<16x128xi32>
    %72 = arith.cmpi eq, %1, %71 : vector<16x128xi32>
    %73 = arith.extui %72 : vector<16x128xi1> to vector<16x128xi32>
    %74 = arith.sitofp %73 : vector<16x128xi32> to vector<16x128xf32>
    %75 = arith.addf %63, %74 : vector<16x128xf32>
    %76 = vector.extract_strided_slice %13 {offsets = [5, 0], sizes = [1, 128], strides = [1, 1]} : vector<16x128xi32> to vector<1x128xi32>
    %77 = vector.broadcast %76 : vector<1x128xi32> to vector<64x128xi32>
    %78 = arith.cmpi eq, %0, %77 : vector<64x128xi32>
    %79 = arith.extui %78 : vector<64x128xi1> to vector<64x128xi32>
    %80 = arith.sitofp %79 : vector<64x128xi32> to vector<64x128xf32>
    %81 = arith.addf %69, %80 : vector<64x128xf32>
    %82 = vector.extract_strided_slice %13 {offsets = [13, 0], sizes = [1, 128], strides = [1, 1]} : vector<16x128xi32> to vector<1x128xi32>
    %83 = vector.broadcast %82 : vector<1x128xi32> to vector<16x128xi32>
    %84 = arith.cmpi eq, %1, %83 : vector<16x128xi32>
    %85 = arith.extui %84 : vector<16x128xi1> to vector<16x128xi32>
    %86 = arith.sitofp %85 : vector<16x128xi32> to vector<16x128xf32>
    %87 = arith.addf %75, %86 : vector<16x128xf32>
    %88 = vector.extract_strided_slice %13 {offsets = [6, 0], sizes = [1, 128], strides = [1, 1]} : vector<16x128xi32> to vector<1x128xi32>
    %89 = vector.broadcast %88 : vector<1x128xi32> to vector<64x128xi32>
    %90 = arith.cmpi eq, %0, %89 : vector<64x128xi32>
    %91 = arith.extui %90 : vector<64x128xi1> to vector<64x128xi32>
    %92 = arith.sitofp %91 : vector<64x128xi32> to vector<64x128xf32>
    %93 = arith.addf %81, %92 : vector<64x128xf32>
    %94 = vector.extract_strided_slice %13 {offsets = [14, 0], sizes = [1, 128], strides = [1, 1]} : vector<16x128xi32> to vector<1x128xi32>
    %95 = vector.broadcast %94 : vector<1x128xi32> to vector<16x128xi32>
    %96 = arith.cmpi eq, %1, %95 : vector<16x128xi32>
    %97 = arith.extui %96 : vector<16x128xi1> to vector<16x128xi32>
    %98 = arith.sitofp %97 : vector<16x128xi32> to vector<16x128xf32>
    %99 = arith.addf %87, %98 : vector<16x128xf32>
    %100 = vector.extract_strided_slice %13 {offsets = [7, 0], sizes = [1, 128], strides = [1, 1]} : vector<16x128xi32> to vector<1x128xi32>
    %101 = vector.broadcast %100 : vector<1x128xi32> to vector<64x128xi32>
    %102 = arith.cmpi eq, %0, %101 : vector<64x128xi32>
    %103 = arith.extui %102 : vector<64x128xi1> to vector<64x128xi32>
    %104 = arith.sitofp %103 : vector<64x128xi32> to vector<64x128xf32>
    %105 = arith.addf %93, %104 : vector<64x128xf32>
    %106 = vector.extract_strided_slice %13 {offsets = [15, 0], sizes = [1, 128], strides = [1, 1]} : vector<16x128xi32> to vector<1x128xi32>
    %107 = vector.broadcast %106 : vector<1x128xi32> to vector<16x128xi32>
    %108 = arith.cmpi eq, %1, %107 : vector<16x128xi32>
    %109 = arith.extui %108 : vector<16x128xi1> to vector<16x128xi32>
    %110 = arith.sitofp %109 : vector<16x128xi32> to vector<16x128xf32>
    %111 = arith.addf %99, %110 : vector<16x128xf32>
    %c0_4 = arith.constant 0 : index
    %c0_5 = arith.constant 0 : index
    %112 = vector.load %arg3[%c0_4, %c0_5] : memref<17x64xf32, #tpu.memory_space<vmem>>, vector<17x64xf32>
    %c0_6 = arith.constant 0 : index
    %c0_7 = arith.constant 0 : index
    %113 = vector.load %arg4[%c0_6, %c0_7] : memref<16x16xf32, #tpu.memory_space<vmem>>, vector<16x16xf32>
    %cst_8 = arith.constant dense<0.000000e+00> : vector<17x128xf32>
    %114 = tpu.matmul %112, %7, %cst_8 {dimension_numbers = #tpu.dot_dimension_numbers<[1], [0], [0], [1], [0, 0, 1, 1], [], []>} : vector<17x64xf32>, vector<64x128xf32>, vector<17x128xf32> -> vector<17x128xf32>
    %cst_9 = arith.constant dense<0.000000e+00> : vector<16x128xf32>
    %115 = tpu.matmul %113, %12, %cst_9 {dimension_numbers = #tpu.dot_dimension_numbers<[1], [0], [0], [1], [0, 0, 1, 1], [], []>} : vector<16x16xf32>, vector<16x128xf32>, vector<16x128xf32> -> vector<16x128xf32>
    %cst_10 = arith.constant dense<0.000000e+00> : vector<17x128xf32>
    %116 = tpu.matmul %112, %105, %cst_10 {dimension_numbers = #tpu.dot_dimension_numbers<[1], [0], [0], [1], [0, 0, 1, 1], [], []>} : vector<17x64xf32>, vector<64x128xf32>, vector<17x128xf32> -> vector<17x128xf32>
    %cst_11 = arith.constant dense<0.000000e+00> : vector<16x128xf32>
    %117 = tpu.matmul %113, %111, %cst_11 {dimension_numbers = #tpu.dot_dimension_numbers<[1], [0], [0], [1], [0, 0, 1, 1], [], []>} : vector<16x16xf32>, vector<16x128xf32>, vector<16x128xf32> -> vector<16x128xf32>
    %118 = vector.extract_strided_slice %114 {offsets = [0, 0], sizes = [16, 128], strides = [1, 1]} : vector<17x128xf32> to vector<16x128xf32>
    %119 = vector.extract_strided_slice %114 {offsets = [16, 0], sizes = [1, 128], strides = [1, 1]} : vector<17x128xf32> to vector<1x128xf32>
    %120 = vector.extract_strided_slice %116 {offsets = [0, 0], sizes = [16, 128], strides = [1, 1]} : vector<17x128xf32> to vector<16x128xf32>
    %121 = arith.mulf %120, %118 : vector<16x128xf32>
    %cst_12 = arith.constant dense<0.000000e+00> : vector<128xf32>
    %122 = vector.multi_reduction <add>, %121, %cst_12 [0] : vector<16x128xf32> to vector<128xf32>
    %123 = vector.shape_cast %122 : vector<128xf32> to vector<1x128xf32>
    %124 = arith.mulf %117, %115 : vector<16x128xf32>
    %cst_13 = arith.constant dense<0.000000e+00> : vector<128xf32>
    %125 = vector.multi_reduction <add>, %124, %cst_13 [0] : vector<16x128xf32> to vector<128xf32>
    %126 = vector.shape_cast %125 : vector<128xf32> to vector<1x128xf32>
    %127 = arith.addf %123, %126 : vector<1x128xf32>
    %cst_14 = arith.constant 1.250000e-01 : f32
    %128 = vector.broadcast %cst_14 : f32 to vector<1x128xf32>
    %129 = arith.mulf %127, %128 : vector<1x128xf32>
    %130 = arith.addf %119, %129 : vector<1x128xf32>
    %131 = arith.negf %130 : vector<1x128xf32>
    %132 = math.exp %131 : vector<1x128xf32>
    %cst_15 = arith.constant 1.000000e+00 : f32
    %133 = vector.broadcast %cst_15 : f32 to vector<1x128xf32>
    %134 = arith.addf %133, %132 : vector<1x128xf32>
    %135 = arith.divf %133, %134 : vector<1x128xf32>
    %c0_16 = arith.constant 0 : index
    %c0_17 = arith.constant 0 : index
    %136 = vector.load %arg5[%c0_16, %c0_17] : memref<1x128xf32, #tpu.memory_space<vmem>>, vector<1x128xf32>
    tpu.vector_store %arg5[%c0_16, %c0_17], %135 {strides = array<i32>} : memref<1x128xf32, #tpu.memory_space<vmem>>, vector<1x128xf32>,
    return
  }
  func.func @transform_0(%arg0: i32) -> (i32, i32) {
    %c0_i32 = arith.constant 0 : i32
    %c0_i32_0 = arith.constant 0 : i32
    return %c0_i32, %arg0 : i32, i32
  }
  func.func @transform_1(%arg0: i32) -> (i32, i32) {
    %c0_i32 = arith.constant 0 : i32
    %c0_i32_0 = arith.constant 0 : i32
    return %c0_i32, %arg0 : i32, i32
  }
  func.func @transform_2(%arg0: i32) -> (i32, i32) {
    %c0_i32 = arith.constant 0 : i32
    %c0_i32_0 = arith.constant 0 : i32
    %c0_i32_1 = arith.constant 0 : i32
    return %c0_i32, %c0_i32_0 : i32, i32
  }
  func.func @transform_3(%arg0: i32) -> (i32, i32) {
    %c0_i32 = arith.constant 0 : i32
    %c0_i32_0 = arith.constant 0 : i32
    %c0_i32_1 = arith.constant 0 : i32
    return %c0_i32, %c0_i32_0 : i32, i32
  }
  func.func @transform_4(%arg0: i32) -> (i32, i32) {
    %c0_i32 = arith.constant 0 : i32
    %c0_i32_0 = arith.constant 0 : i32
    return %c0_i32, %arg0 : i32, i32
  }
}

</mosaic_0001>

<bundles_post_ra>
// kernel: tpu_custom_call.1
= control target key start
LH: loop header
LB: loop body
LE: loop exit
PB: predicated region body
PF: predicated region fallthrough
CT: control target
= control target key end

     0   :  { %9 = vsyncpa [#allocation3], 0  ;;  %s2472_s0 = inlined_call_operand.hbm [shape: s32[2,256], index: 0, kind: input, shape index: {}]   ;;  %s2473_s1 = inlined_call_operand.hbm [shape: s32[16,256], index: 1, kind: input, shape index: {}]   ;;  %s2474_s2 = inlined_call_operand.hbm [shape: f32[17,64], index: 2, kind: input, shape index: {}]   ;;  %s2475_s3 = inlined_call_operand.hbm [shape: f32[16,16], index: 3, kind: input, shape index: {}]   ;;  %s2476_s4 = inlined_call_operand.hbm [shape: f32[1,256], index: 4, kind: output, shape index: {}]  }
   0x1   :  { %11 = vsyncpa [#allocation3 + $0x1], 0 }
   0x2   :  { %12 = vsyncpa [#allocation6], 0 }
   0x3   :  { %14 = vsyncpa [#allocation6 + $0x1], 0 }
   0x4   :  { %15 = vsyncpa [#allocation9], 0 }
   0x5   :  { %16 = vsyncpa [#allocation4], 0 }
   0x6   :  { %18 = vsyncpa [#allocation4 + $0x1], 0  ;;  %s1764_s15 = smov 0   ;;  %s1766_s16 = smov 0  }
   0x7   :  { %s1768_s17 = smov 0   ;;  %s1770_s18 = smov 0  }
   0x8 LB: > { %s1785_s19 = sadd.s32 4294967295, %s1725_s18   ;;  %s1194_s20 = sadd.s32 4294967294, %s1725_s18   ;;  %s1725_s18 = sphi %s1770_s18, %s2502_s18   ;;  %s1721_s17 = sphi %s1768_s17, %s2501_s17   ;;  %s1717_s16 = sphi %s1766_s16, %s2500_s16   ;;  %s1713_s15 = sphi %s1764_s15, %s2499_s15  }
   0x9   : > { %p44_p0 = scmp.ne.s32.totalorder %s1717_s16, %s1713_s15  ;;  %p2477_p1 = scmp.eq.s32.totalorder %s1785_s19, 0 }
   0xa   : > { %p142_p3 = scmp.eq.s32.totalorder %s1194_s20, 1  ;;  %p1195_p5 = scmp.ge.s32.totalorder %s1725_s18, 1 }
   0xb   : > { %p1794_p4 = por %p2477_p1, %p44_p0  ;;  %p149_p7 = scmp.lt.s32.totalorder %s1725_s18, 3 }
   0xc   : > { %p1799_p6 = por %p142_p3, %p44_p0  ;;  %s1727_s24 = smov [#allocation7]  }
   0xd   : > { %s2482_s21 = scalar_select %p1794_p4, 1, 0 }
   0xe   : > { %s2483_s22 = scalar_select %p1799_p6, 1, 0 }
   0xf   : > { %p1804_p8 = pnand %p1195_p5, %p149_p7  ;;  %s161_s25 = sshll.u32 %s1727_s24, 4  ;;  %s1808_s25 = int_to_ptr.vmem [resolvable:$true] %s161_s25 }
  0x10   : > { %s1728_s27 = smov [#allocation8]   ;;  %s1531_s5 = scalar_lea.hbm %s2474_s2, 384 }
  0x11   : > { %p1462_p9 = pneg %p1804_p8  ;;  %s174_s28 = sshll.u32 %s1728_s27, 4  ;;  %s1819_s28 = int_to_ptr.vmem [resolvable:$true] %s174_s28 }
  0x12   : > { %p1532_p12 = scmp.ne.s32.totalorder %s2474_s2, %s1531_s5  ;;  %p1538_p5 = scmp.lt.u32.totalorder %s1531_s5, %s2474_s2 }
  0x13   : > { %p1815_p11 = pnand %p1462_p9, %p2477_p1 }
  0x15   : > { %p1533_p13 = pneg %p1815_p11 }
  0x17   : > { %p1534_p0 = pnand %p1533_p13, %p1532_p12 }
  0x19   : > { %p1535_p3 = pneg %p1534_p0 }
  0x1b   : > { %p1540_p7 = pnand %p1538_p5, %p1535_p3 }
  0x1d   : > { %1543 = shalt.err (!%p1540_p7)
}
  0x1e   : > { %s1544_s10 = scalar_lea.vmem %s1808_s25, 384  ;;  %p1552_p2 = scmp.lt.s32.totalorder %s1808_s25, %s1808_s25 }
  0x1f   : > { %p1545_p9 = scmp.ne.s32.totalorder %s1808_s25, %s1544_s10  ;;  %p1553_p12 = scmp.lt.s32.totalorder %s1544_s10, %s1544_s10 }
  0x21   : > { %p1547_p10 = pnand %p1545_p9, %p1533_p13  ;;  %p1554_p0 = por %p1553_p12, %p1552_p2 }
  0x23   : > { %p1548_p1 = pneg %p1547_p10 }
  0x25   : > { %p1555_p6 = pnand %p1554_p0, %p1548_p1 }
  0x27   : > { %1558 = shalt.err (!%p1555_p6)
}
  0x28   : > { %s2478_s11 = smov 128   ;;  %s2481_s12 = smov 8  }
  0x29   : > { %1465 = dma.hbm_to_vmem [thread:$0]  (!%p1815_p11), %s2474_s2, 384, %s1808_s25, [#allocation6], %s2478_s11, %s2478_s11, %s2481_s12  }
  0x2a   : > { %s1559_s27 = scalar_lea.hbm %s2475_s3, 256 }
  0x2b   : > { %p1560_p1 = scmp.ne.s32.totalorder %s2475_s3, %s1559_s27  ;;  %p1566_p10 = scmp.lt.u32.totalorder %s1559_s27, %s2475_s3 }
  0x2d   : > { %p1562_p2 = pnand %p1560_p1, %p1533_p13 }
  0x2f   : > { %p1563_p6 = pneg %p1562_p2 }
  0x31   : > { %p1568_p3 = pnand %p1566_p10, %p1563_p6 }
  0x33   : > { %1571 = shalt.err (!%p1568_p3)
}
  0x34   : > { %s1572_s25 = scalar_lea.vmem %s1819_s28, 256  ;;  %p1580_p12 = scmp.lt.s32.totalorder %s1819_s28, %s1819_s28 }
  0x35   : > { %p1573_p5 = scmp.ne.s32.totalorder %s1819_s28, %s1572_s25  ;;  %p1581_p0 = scmp.lt.s32.totalorder %s1572_s25, %s1572_s25 }
  0x37   : > { %p1575_p7 = pnand %p1573_p5, %p1533_p13  ;;  %p1582_p1 = por %p1581_p0, %p1580_p12 }
  0x39   : > { %p1576_p9 = pneg %p1575_p7 }
  0x3b   : > { %p1583_p2 = pnand %p1582_p1, %p1576_p9 }
  0x3d   : > { %1586 = shalt.err (!%p1583_p2)
}
  0x3e   : > { %1468 = dma.hbm_to_vmem [thread:$0]  (!%p1815_p11), %s2475_s3, 256, %s1819_s28, [#allocation9], %s2478_s11, %s2478_s11, %s2481_s12  }
  0x3f   : > { %s1880_s26 = sadd.s32 1, %s1725_s18   ;;  %s31_s9 = sadd.s32 1, %s1721_s17 }
  0x40   : > { %s28_s10 = ssub.s32 %s1725_s18, %s1880_s26  ;;  %p38_p13 = scmp.ne.s32.totalorder %s1721_s17, %s1717_s16 }
  0x41   : > { %p29_p6 = scmp.eq.s32.totalorder %s28_s10, 0  ;;  %p39_p10 = scmp.eq.s32.totalorder %s1725_s18, 0 }
  0x42   : > { %p2486_p3 = scmp.eq.s32.totalorder %s1785_s19, 1  ;;  %p1482_p7 = scmp.lt.s32.totalorder %s1725_s18, 2 }
  0x43   : > { %s1896_s14 = scalar_select %p29_p6, %s1721_s17, %s31_s9  }
  0x44   : > { %p1890_p5 = por %p2486_p3, %p38_p13  ;;  %p40_p9 = por %p39_p10, %p38_p13 }
  0x45   : > { %s1899_s20 = sand.u32 1, %s1721_s17   ;;  %s1200_s24 = sshll.u32 %s1725_s18, 5 }
  0x46   : > { %s2487_s13 = scalar_select %p1890_p5, 1, 0 }
  0x47   : > { %s1199_s28 = sshll.u32 %s1899_s20, 1  ;;  %s1906_s30 = scalar_lea.hbm %s2472_s0, %s1200_s24 }
  0x48   : > { %s192_s5 = scalar_lea.vmem [#allocation2], %s1199_s28  ;;  %p1910_p11 = pnand %p1482_p7, %p40_p9 }
  0x49   : > { %s199_s6 = sshll.u32 %s192_s5, 4  ;;  %s1201_s7 = sshll.u32 %s1899_s20, 4  ;;  %s1908_s6 = int_to_ptr.vmem [resolvable:$true] %s199_s6 }
  0x4a   : > { %s206_s8 = sand.u32 1, %s1725_s18   ;;  %s189_s9 = scalar_lea.sflag [#allocation3], %s1899_s20 }
  0x4b   : > { %s1587_s10 = scalar_lea.hbm %s1906_s30, 32  ;;  %p1589_p0 = pneg %p1910_p11 }
  0x4c   : > { %p1588_p12 = scmp.ne.s32.totalorder %s1906_s30, %s1587_s10  ;;  %s1592_s27 = scalar_lea.hbm %s2472_s0, 64 }
  0x4d   : > { %p1593_p13 = scmp.lt.u32.totalorder %s1906_s30, %s2472_s0  ;;  %p1594_p6 = scmp.lt.u32.totalorder %s1592_s27, %s1587_s10 }
  0x4e   : > { %p1590_p1 = pnand %p1589_p0, %p1588_p12  ;;  %p1596_p3 = scmp.lt.u32.totalorder %s1587_s10, %s1906_s30 }
  0x4f   : > { %p1595_p10 = por %p1594_p6, %p1593_p13 }
  0x50   : > { %p1591_p2 = pneg %p1590_p1 }
  0x51   : > { %p1597_p7 = por %p1596_p3, %p1595_p10 }
  0x53   : > { %p1598_p9 = pnand %p1597_p7, %p1591_p2 }
  0x55   : > { %1601 = shalt.err (!%p1598_p9)
}
  0x56   : > { %s1602_s11 = scalar_lea.vmem %s1908_s6, 32  ;;  %s1731_s28 = smov [#allocation2]  }
  0x57   : > { %p1603_p12 = scmp.ne.s32.totalorder %s1908_s6, %s1602_s11  ;;  %s1607_s24 = sshll.u32 %s1731_s28, 4  ;;  %s1608_s24 = int_to_ptr.vmem [resolvable:$false] %s1607_s24 }
  0x58   : > { %s1609_s29 = scalar_lea.vmem %s1608_s24, 64  ;;  %p1610_p4 = scmp.lt.s32.totalorder %s1908_s6, %s1608_s24 }
  0x59   : > { %p1605_p1 = pnand %p1603_p12, %p1589_p0  ;;  %p1611_p13 = scmp.lt.s32.totalorder %s1609_s29, %s1602_s11 }
  0x5b   : > { %p1606_p5 = pneg %p1605_p1  ;;  %p1612_p6 = por %p1611_p13, %p1610_p4 }
  0x5d   : > { %p1613_p10 = pnand %p1612_p6, %p1606_p5 }
  0x5f   : > { %1616 = shalt.err (!%p1613_p10)
}
  0x60   : > { %1472 = dma.hbm_to_vmem [thread:$0]  (!%p1910_p11), %s1906_s30, 32, %s1908_s6, %s189_s9  }
  0x61   : > { %s210_s10 = scalar_lea.vmem [#allocation5], %s1201_s7  ;;  %s1202_s5 = sshll.u32 %s1725_s18, 7 }
  0x62   : > { %s216_s27 = sshll.u32 %s210_s10, 4  ;;  %s1950_s24 = scalar_lea.hbm %s2473_s1, %s1202_s5  ;;  %s1944_s27 = int_to_ptr.vmem [resolvable:$true] %s216_s27 }
  0x63   : > { %s1954_s29 = scalar_lea.sflag [#allocation6], %s206_s8  ;;  %s1617_s12 = scalar_lea.hbm %s1950_s24, 256 }
  0x64   : > { %p1618_p4 = scmp.ne.s32.totalorder %s1950_s24, %s1617_s12  ;;  %s1622_s6 = scalar_lea.hbm %s2473_s1, 512 }
  0x65   : > { %p1623_p3 = scmp.lt.u32.totalorder %s1950_s24, %s2473_s1  ;;  %p1624_p7 = scmp.lt.u32.totalorder %s1622_s6, %s1617_s12 }
  0x66   : > { %p1620_p5 = pnand %p1618_p4, %p1589_p0  ;;  %p1626_p12 = scmp.lt.u32.totalorder %s1617_s12, %s1950_s24 }
  0x67   : > { %p1625_p9 = por %p1624_p7, %p1623_p3 }
  0x68   : > { %p1621_p2 = pneg %p1620_p5 }
  0x69   : > { %p1627_p1 = por %p1626_p12, %p1625_p9 }
  0x6b   : > { %p1628_p13 = pnand %p1627_p1, %p1621_p2 }
  0x6d   : > { %1631 = shalt.err (!%p1628_p13)
}
  0x6e   : > { %s1632_s8 = scalar_lea.vmem %s1944_s27, 256  ;;  %s1732_s10 = smov [#allocation5]  }
  0x6f   : > { %p1633_p6 = scmp.ne.s32.totalorder %s1944_s27, %s1632_s8  ;;  %s1637_s5 = sshll.u32 %s1732_s10, 4  ;;  %s1638_s5 = int_to_ptr.vmem [resolvable:$false] %s1637_s5 }
  0x70   : > { %s1639_s28 = scalar_lea.vmem %s1638_s5, 512  ;;  %p1640_p5 = scmp.lt.s32.totalorder %s1944_s27, %s1638_s5 }
  0x71   : > { %p1635_p10 = pnand %p1633_p6, %p1589_p0  ;;  %p1641_p3 = scmp.lt.s32.totalorder %s1639_s28, %s1632_s8 }
  0x73   : > { %p1636_p4 = pneg %p1635_p10  ;;  %p1642_p7 = por %p1641_p3, %p1640_p5 }
  0x75   : > { %p1643_p9 = pnand %p1642_p7, %p1636_p4 }
  0x77   : > { %1646 = shalt.err (!%p1643_p9)
}
  0x78   : > { %s1733_s12 = smov 256   ;;  %s2489_s11 = smov 8  }
  0x79   : > { %s2490_s20 = smov 128   ;;  %228 = sbr.rel (%p1804_p8) target bundleno = 499 (0x1f3), region = 36 }
  0x7a   : > { %1475 = dma.hbm_to_vmem [thread:$0]  (!%p1910_p11), %s1950_s24, 256, %s1944_s27, %s1954_s29, %s1733_s12, %s2490_s20, %s2489_s11  }
  0x7b   : > { %s1985_s30 = sand.u32 (!%p1804_p8), 1, %s1717_s16   ;;  %p2491_p0 = scmp.ne.s32.totalorder (!%p1804_p8), %s2482_s21, 0 }
  0x7c   : > { %s1204_s6 = sshll.u32 (!%p1804_p8), %s1985_s30, 1  ;;  %s231_s7 = scalar_lea.sflag (!%p1804_p8), [#allocation3], %s1985_s30 }
  0x7d   : > { %s1989_s9 = scalar_lea.vmem (!%p1804_p8), [#allocation2], %s1204_s6 }
  0x80   : > { %1692 = dma.done.wait (%p2491_p0), %s231_s7, 32  }
  0x81   : > { %1694 = vsyncadd (%p2491_p0), %s231_s7, 4294967264  ;;  %s239_s23 = sand.u32 1, %s1785_s19   ;;  %s1205_s25 = sshll.u32 %s1985_s30, 4 }
  0x82   : > { %s240_s27 = scalar_lea.sflag [#allocation6], %s239_s23  ;;  %s243_s24 = scalar_lea.vmem [#allocation5], %s1205_s25 }
  0x83   : > { %1696 = dma.done.wait (%p2491_p0), %s240_s27, 256  }
  0x84   : > { %1698 = vsyncadd (%p2491_p0), %s240_s27, 4294967040  ;;  %p2492_p8 = scmp.eq.s32.totalorder %s1785_s19, 0 }
  0x86   : > { %1700 = dma.done.wait (%p2492_p8), [#allocation6], 384   ;;  %p2493_p11 = pmov %p2492_p8 }
  0x87   : > { %p2494_p2 = pmov %p2492_p8 }
  0x88   : > { %1702 = vsyncadd (%p2493_p11), [#allocation6], 4294966912 }
  0x89   : > { %1704 = dma.done.wait (%p2494_p2), [#allocation9], 256   ;;  %p2495_p12 = pmov %p2494_p2 }
  0x8a   : > { %v280_v0 = vlaneseq  ;;  %v1734_v1 = vmov 0.0|0.0   ;;  %vm1735_vm0 = vmmov 0   ;;  %v1736_v3 = vmov 0.0   ;;  %v289_v16 = vld [vmem:[%s1989_s9] sm:$0x3]  ;;  %v2037_v17 = vld [vmem:[%s243_s24] sm:$0xff] }
  0x8b   : > { %1706 = vsyncadd (%p2495_p12), [#allocation9], 4294967040  ;;  %1416 = vmatprep.subr.bf16.mxu0 %v1734_v1  ;;  %1368 = vmatprep.mubr.msk.f32.mxu0 %vm1735_vm0, %v1736_v3  ;;  %vm809_vm1 = vcmask 130048   ;;  %v2039_v18 = vld [vmem:[%s243_s24 + $0x8] sm:$0xff]  ;;  %v1737_v30 = vmov 1.0|1.0  }
  0x8c   : > { %v2010_v2 = vshrl.u32 %v280_v0, 7  ;;  %v2053_v25 = vld [vmem:[#allocation8] sm:$0xff]  ;;  %v2127_v40 = vld [vmem:[#allocation8 + $0x8] sm:$0xff]  ;;  %s1319_s21 = sshll.u32 %s1785_s19, 4  ;;  %s279_s29 = scalar_lea.vmem [#allocation10], %s1985_s30 }
  0x8d   : > { %1381 = vmatprep.mubr.msk.f32.mxu1 %vm809_vm1, %v2053_v25  ;;  %v2189_v60 = vld [vmem:[#allocation7] sm:$0xff]  ;;  %s1086_s8 = sshll.u32 %s279_s29, 4  ;;  %s2428_s28 = scalar_lea.hbm %s2476_s4, %s1319_s21  ;;  %s2430_s8 = int_to_ptr.vmem [resolvable:$true] %s1086_s8 }
  0x8e   : > { %v2015_v4 = vadd.s32 8, %v2010_v2  ;;  %v292_v5 = vsub.s32 0, %v2010_v2  ;;  %v2019_v6 = vadd.s32 16, %v2010_v2  ;;  %v2022_v7 = vadd.s32 24, %v2010_v2  ;;  %s1074_s12 = scalar_lea.sflag [#allocation4], %s1985_s30  ;;  %s1647_s11 = scalar_lea.vmem %s2430_s8, 16 }
  0x8f   : > { %v2025_v8 = vadd.s32 32, %v2010_v2  ;;  %v2028_v9 = vadd.s32 40, %v2010_v2  ;;  %v320_v10 = vsub.s32 1, %v2010_v2  ;;  %v428_v11 = vsub.s32 2, %v2010_v2  ;;  %p1648_p1 = scmp.ne.s32.totalorder %s2430_s8, %s1647_s11  ;;  %p2496_p13 = scmp.ne.s32.totalorder %s2487_s13, 0 }
  0x90   : > { %v476_v12 = vsub.s32 3, %v2010_v2  ;;  %v524_v13 = vsub.s32 4, %v2010_v2  ;;  %v572_v14 = vsub.s32 5, %v2010_v2  ;;  %v620_v15 = vsub.s32 6, %v2010_v2  ;;  %s1738_s19 = smov [#allocation10]  }
  0x91   : > { %v2042_v19 = vadd.s32 48, %v2010_v2  ;;  %v2045_v20 = vadd.s32 56, %v2010_v2  ;;  %v2047_v21 = vrot.slane %v289_v16, %v292_v5  ;;  %v321_v22 = vrot.slane %v289_v16, %v320_v10  ;;  %p1649_p6 = pnand %p1648_p1, %p2496_p13  ;;  %s1651_s20 = sshll.u32 %s1738_s19, 4  ;;  %s1652_s20 = int_to_ptr.vmem [resolvable:$false] %s1651_s20 }
  0x92   : > { %v2050_v23 = vrot.slane %v2037_v17, %v292_v5  ;;  %v369_v24 = vrot.slane %v2039_v18, %v292_v5  ;;  %v2056_v26 = vrot.slane %v2037_v17, %v320_v10  ;;  %v417_v27 = vrot.slane %v2039_v18, %v320_v10  ;;  %s1653_s6 = scalar_lea.vmem %s1652_s20, 32  ;;  %p1654_p4 = scmp.lt.s32.totalorder %s2430_s8, %s1652_s20 }
  0x93   : > { %v2062_v28 = vrot.slane %v2037_v17, %v428_v11  ;;  %v2067_v29 = vrot.slane %v2037_v17, %v476_v12  ;;  %vm294_vm2 = vcmp.eq.s32.totalorder %v2010_v2, %v2047_v21  ;;  %vm295_vm3 = vcmp.eq.s32.totalorder %v2015_v4, %v2047_v21  ;;  %p1650_p10 = pneg %p1649_p6  ;;  %p1655_p5 = scmp.lt.s32.totalorder %s1653_s6, %s1647_s11 }
  0x94   : > { %vm296_vm4 = vcmp.eq.s32.totalorder %v2019_v6, %v2047_v21  ;;  %vm297_vm5 = vcmp.eq.s32.totalorder %v2022_v7, %v2047_v21  ;;  %vm1417_vm6 = vmpackc.low %vm295_vm3, %vm294_vm2  ;;  %vm298_vm7 = vcmp.eq.s32.totalorder %v2025_v8, %v2047_v21  ;;  %vm299_vm8 = vcmp.eq.s32.totalorder %v2028_v9, %v2047_v21 }
  0x95   : > { %vm322_vm9 = vcmp.eq.s32.totalorder %v2010_v2, %v321_v22  ;;  %vm323_vm10 = vcmp.eq.s32.totalorder %v2015_v4, %v321_v22  ;;  %1418 = vmatpush3.bf16.msk.msra.mxu0 %vm1417_vm6, %v1737_v30  ;;  %vm370_vm11 = vcmp.eq.s32.totalorder %v2010_v2, %v369_v24  ;;  %vm371_vm12 = vcmp.eq.s32.totalorder %v2015_v4, %v369_v24  ;;  %vm1420_vm15 = vmpackc.low %vm297_vm5, %vm296_vm4  ;;  %p1656_p3 = por %p1655_p5, %p1654_p4 }
  0x96   : > { %vm418_vm13 = vcmp.eq.s32.totalorder %v2010_v2, %v417_v27  ;;  %vm419_vm14 = vcmp.eq.s32.totalorder %v2015_v4, %v417_v27  ;;  %1419 = vmatprep.subr.bf16.mxu0 %v1734_v1  ;;  %v1226_v31 = vsel %vm370_vm11, 1.0, %v1736_v3  ;;  %v1227_v32 = vsel %vm371_vm12, 1.0, %v1736_v3  ;;  %vm1428_vm2 = vmpackc.low %vm323_vm10, %vm322_vm9 }
  0x97   : > { %v1236_v33 = vsel %vm418_vm13, 1.0, %v1736_v3  ;;  %v1237_v34 = vsel %vm419_vm14, 1.0, %v1736_v3  ;;  %v2102_v37 = vrot.slane %v2037_v17, %v524_v13  ;;  %v2107_v38 = vrot.slane %v2037_v17, %v572_v14  ;;  %1429 = vmatprep.subr.msk.bf16.mxu1 %vm1428_vm2, %v1737_v30  ;;  %vm1423_vm12 = vmpackc.low %vm299_vm8, %vm298_vm7  ;;  %p1657_p7 = pnand %p1656_p3, %p1650_p10 }
  0x98   : > { %v2095_v35 = vadd.f32 %v1236_v33, %v1226_v31  ;;  %v2097_v36 = vadd.f32 %v1237_v34, %v1227_v32  ;;  %v2116_v39 = vrot.slane %v2037_v17, %v620_v15  ;;  %vm300_vm3 = vcmp.eq.s32.totalorder %v2042_v19, %v2047_v21  ;;  %1431 = vmatpush3.bf16.msk.msra.mxu1 %vm1428_vm2, %v1737_v30  ;;  %v2219_v32 = vld [vmem:[#allocation7 + $0x8] sm:$0xff] }
  0x99   : > { %vm301_vm4 = vcmp.eq.s32.totalorder %v2045_v20, %v2047_v21  ;;  %vm334_vm5 = vcmp.eq.s32.totalorder %v2010_v2, %v2050_v23  ;;  %1421 = vmatpush3.bf16.msk.msra.mxu0 %vm1420_vm15, %v1737_v30  ;;  %vm719_vm6 = vcmask 523264   ;;  %vm335_vm9 = vcmp.eq.s32.totalorder %v2015_v4, %v2050_v23  ;;  %1432 = vmatprep.subr.bf16.mxu1 %v1734_v1 }
  0x9a   : > { %v1218_v41 = vsel %vm334_vm5, 1.0, %v1736_v3  ;;  %vm382_vm10 = vcmp.eq.s32.totalorder %v2010_v2, %v2056_v26  ;;  %vm383_vm11 = vcmp.eq.s32.totalorder %v2015_v4, %v2056_v26  ;;  %1422 = vmatprep.subr.bf16.mxu0 %v1734_v1  ;;  %v1219_v42 = vsel %vm335_vm9, 1.0, %v1736_v3  ;;  %vm1426_vm2 = vmpackc.low %vm301_vm4, %vm300_vm3 }
  0x9b   : > { %v1228_v43 = vsel %vm382_vm10, 1.0, %v1736_v3  ;;  %v1229_v44 = vsel %vm383_vm11, 1.0, %v1736_v3  ;;  %vm430_vm13 = vcmp.eq.s32.totalorder %v2010_v2, %v2062_v28  ;;  %vm431_vm14 = vcmp.eq.s32.totalorder %v2015_v4, %v2062_v28  ;;  %1382 = vmatmul.mubr.msk.f32.vlgmr.msra.gmra.mrb[0].mxu1 %vm809_vm1, %v2127_v40 }
  0x9c   : > { %v406_v45 = vadd.f32 %v1228_v43, %v1218_v41  ;;  %v407_v46 = vadd.f32 %v1229_v44, %v1219_v42  ;;  %v1238_v47 = vsel %vm430_vm13, 1.0, %v1736_v3  ;;  %v1239_v48 = vsel %vm431_vm14, 1.0, %v1736_v3  ;;  %1400 = vmatprep.mubr.msk.f32.mxu1 %vm1735_vm0, %v1736_v3 }
  0x9d   : > { %vm478_vm7 = vcmp.eq.s32.totalorder %v2010_v2, %v2067_v29  ;;  %vm479_vm8 = vcmp.eq.s32.totalorder %v2015_v4, %v2067_v29  ;;  %vm526_vm15 = vcmp.eq.s32.totalorder %v2010_v2, %v2102_v37  ;;  %1424 = vmatpush3.bf16.msk.msra.mxu0 %vm1423_vm12, %v1737_v30  ;;  %vm527_vm5 = vcmp.eq.s32.totalorder %v2015_v4, %v2102_v37 }
  0x9e   : > { %v454_v49 = vadd.f32 %v1238_v47, %v406_v45  ;;  %v455_v50 = vadd.f32 %v1239_v48, %v407_v46  ;;  %v1248_v51 = vsel %vm478_vm7, 1.0, %v1736_v3  ;;  %v1249_v52 = vsel %vm479_vm8, 1.0, %v1736_v3  ;;  %1425 = vmatprep.subr.bf16.mxu0 %v1734_v1 }
  0x9f   : > { %v1258_v53 = vsel %vm526_vm15, 1.0, %v1736_v3  ;;  %vm574_vm9 = vcmp.eq.s32.totalorder %v2010_v2, %v2107_v38  ;;  %vm575_vm10 = vcmp.eq.s32.totalorder %v2015_v4, %v2107_v38  ;;  %v1259_v56 = vsel %vm527_vm5, 1.0, %v1736_v3 }
  0xa0   : > { %v502_v54 = vadd.f32 %v1248_v51, %v454_v49  ;;  %v503_v55 = vadd.f32 %v1249_v52, %v455_v50  ;;  %v1268_v57 = vsel %vm574_vm9, 1.0, %v1736_v3  ;;  %v1269_v58 = vsel %vm575_vm10, 1.0, %v1736_v3  ;;  %v2238_v51 = vld [vmem:[#allocation7 + $0x10] sm:$0x1] }
  0xa1   : > { %vm622_vm3 = vcmp.eq.s32.totalorder %v2010_v2, %v2116_v39  ;;  %vm623_vm4 = vcmp.eq.s32.totalorder %v2015_v4, %v2116_v39  ;;  %v668_v59 = vsub.s32 7, %v2010_v2  ;;  %1427 = vmatpush3.bf16.msk.msra.mxu0 %vm1426_vm2, %v1737_v30  ;;  %vm336_vm11 = vcmp.eq.s32.totalorder %v2019_v6, %v2050_v23 }
  0xa2   : > { %v550_v61 = vadd.f32 %v1258_v53, %v502_v54  ;;  %v551_v62 = vadd.f32 %v1259_v56, %v503_v55  ;;  %v1278_v63 = vsel %vm622_vm3, 1.0, %v1736_v3  ;;  %v1279_v0 = vsel %vm623_vm4, 1.0, %v1736_v3 }
  0xa3   : > { %v2196_v5 = vrot.slane %v2037_v17, %v668_v59  ;;  %vm337_vm12 = vcmp.eq.s32.totalorder %v2022_v7, %v2050_v23  ;;  %vm384_vm13 = vcmp.eq.s32.totalorder %v2019_v6, %v2056_v26  ;;  %v1220_v21 = vsel %vm336_vm11, 1.0, %v1736_v3 }
  0xa4   : > { %v598_v10 = vadd.f32 %v1268_v57, %v550_v61  ;;  %v599_v16 = vadd.f32 %v1269_v58, %v551_v62  ;;  %v1221_v22 = vsel %vm337_vm12, 1.0, %v1736_v3  ;;  %1369 = vmatmul.mubr.msk.f32.vlgmr.msra.gmra.mrb[0].mxu0 %vm719_vm6, %v2189_v60  ;;  %vm385_vm8 = vcmp.eq.s32.totalorder %v2022_v7, %v2056_v26 }
  0xa5   : > { %vm670_vm14 = vcmp.eq.s32.totalorder %v2010_v2, %v2196_v5  ;;  %vm671_vm7 = vcmp.eq.s32.totalorder %v2015_v4, %v2196_v5  ;;  %v1230_v17 = vsel %vm384_vm13, 1.0, %v1736_v3  ;;  %1371 = vmatprep.mubr.msk.f32.mxu0 %vm1735_vm0, %v1736_v3  ;;  %v1231_v33 = vsel %vm385_vm8, 1.0, %v1736_v3 }
  0xa6   : > { %v646_v24 = vadd.f32 %v1278_v63, %v598_v10  ;;  %v647_v27 = vadd.f32 %v1279_v0, %v599_v16  ;;  %v1288_v30 = vsel %vm670_vm14, 1.0, %v1736_v3  ;;  %v1289_v31 = vsel %vm671_vm7, 1.0, %v1736_v3 }
  0xa7   : > { %v408_v34 = vadd.f32 %v1230_v17, %v1220_v21  ;;  %vm432_vm15 = vcmp.eq.s32.totalorder %v2019_v6, %v2062_v28  ;;  %vm433_vm2 = vcmp.eq.s32.totalorder %v2022_v7, %v2062_v28  ;;  %v409_v43 = vadd.f32 %v1231_v33, %v1221_v22 }
  0xa8   : > { %v694_v41 = vadd.f32 %v1288_v30, %v646_v24  ;;  %v695_v42 = vadd.f32 %v1289_v31, %v647_v27  ;;  %v1240_v44 = vsel %vm432_vm15, 1.0, %v1736_v3  ;;  %1372 = vmatmul.mubr.msk.f32.gmra.mrb[2].mxu0 %vm719_vm6, %v2219_v32  ;;  %v1241_v45 = vsel %vm433_vm2, 1.0, %v1736_v3 }
  0xa9   : > { %v456_v46 = vadd.f32 %v1240_v44, %v408_v34  ;;  %vm480_vm5 = vcmp.eq.s32.totalorder %v2019_v6, %v2067_v29  ;;  %vm481_vm9 = vcmp.eq.s32.totalorder %v2022_v7, %v2067_v29  ;;  %v457_v48 = vadd.f32 %v1241_v45, %v409_v43  ;;  %1374 = vmatprep.mubr.msk.f32.mxu0 %vm1735_vm0, %v1736_v3 }
  0xaa   : > { %v1433_v47 = vpack.c.bf16 %v695_v42, %v694_v41  ;;  %v1250_v49 = vsel %vm480_vm5, 1.0, %v1736_v3  ;;  %v1251_v50 = vsel %vm481_vm9, 1.0, %v1736_v3  ;;  %vm528_vm10 = vcmp.eq.s32.totalorder %v2019_v6, %v2102_v37 }
  0xab   : > { %v504_v52 = vadd.f32 %v1250_v49, %v456_v46  ;;  %vm529_vm3 = vcmp.eq.s32.totalorder %v2022_v7, %v2102_v37  ;;  %vm576_vm4 = vcmp.eq.s32.totalorder %v2019_v6, %v2107_v38  ;;  %v505_v53 = vadd.f32 %v1251_v50, %v457_v48 }
  0xac   : > { %1434 = vmatpush3.bf16.msra.mxu1 %v1433_v47  ;;  %v1260_v54 = vsel %vm528_vm10, 1.0, %v1736_v3  ;;  %v1261_v55 = vsel %vm529_vm3, 1.0, %v1736_v3  ;;  %vm577_vm11 = vcmp.eq.s32.totalorder %v2022_v7, %v2107_v38  ;;  %v1270_v57 = vsel %vm576_vm4, 1.0, %v1736_v3  ;;  %1375 = vmatmul.mubr.msk.f32.gmra.mrb[4].mxu0 %vm719_vm6, %v2238_v51 }
  0xad   : > { %1435 = vmatprep.subr.bf16.mxu1 %v1734_v1  ;;  %v552_v56 = vadd.f32 %v1260_v54, %v504_v52  ;;  %v1271_v58 = vsel %vm577_vm11, 1.0, %v1736_v3  ;;  %vm624_vm12 = vcmp.eq.s32.totalorder %v2019_v6, %v2116_v39  ;;  %v553_v61 = vadd.f32 %v1261_v55, %v505_v53  ;;  %1413 = vmatprep.mubr.msk.f32.mxu0 %vm809_vm1, %v2053_v25 }
  0xae   : > { %vm625_vm13 = vcmp.eq.s32.totalorder %v2022_v7, %v2116_v39  ;;  %v1280_v62 = vsel %vm624_vm12, 1.0, %v1736_v3  ;;  %vm672_vm14 = vcmp.eq.s32.totalorder %v2019_v6, %v2196_v5  ;;  %vm673_vm7 = vcmp.eq.s32.totalorder %v2022_v7, %v2196_v5 }
  0xaf   : > { %v600_v63 = vadd.f32 %v1270_v57, %v552_v56  ;;  %v1281_v0 = vsel %vm625_vm13, 1.0, %v1736_v3  ;;  %v1290_v10 = vsel %vm672_vm14, 1.0, %v1736_v3  ;;  %v601_v16 = vadd.f32 %v1271_v58, %v553_v61 }
  0xb0   : > { %v1291_v21 = vsel %vm673_vm7, 1.0, %v1736_v3  ;;  %v465_v22 = vrot.slane %v2039_v18, %v428_v11  ;;  %v513_v6 = vrot.slane %v2039_v18, %v476_v12  ;;  %v561_v17 = vrot.slane %v2039_v18, %v524_v13 }
  0xb1   : > { %v648_v25 = vadd.f32 %v1280_v62, %v600_v63  ;;  %v609_v7 = vrot.slane %v2039_v18, %v572_v14  ;;  %v657_v24 = vrot.slane %v2039_v18, %v620_v15  ;;  %v649_v27 = vadd.f32 %v1281_v0, %v601_v16 }
  0xb2   : > { %vm466_vm8 = vcmp.eq.s32.totalorder %v2010_v2, %v465_v22  ;;  %vm467_vm15 = vcmp.eq.s32.totalorder %v2015_v4, %v465_v22  ;;  %vm514_vm2 = vcmp.eq.s32.totalorder %v2010_v2, %v513_v6  ;;  %vm515_vm5 = vcmp.eq.s32.totalorder %v2015_v4, %v513_v6 }
  0xb3   : > { %v696_v11 = vadd.f32 %v1290_v10, %v648_v25  ;;  %v1246_v12 = vsel %vm466_vm8, 1.0, %v1736_v3  ;;  %v1247_v13 = vsel %vm467_vm15, 1.0, %v1736_v3  ;;  %v697_v30 = vadd.f32 %v1291_v21, %v649_v27 }
  0xb4   : > { %v472_v14 = vadd.f32 %v1246_v12, %v2095_v35  ;;  %v473_v31 = vadd.f32 %v1247_v13, %v2097_v36  ;;  %v1256_v15 = vsel %vm514_vm2, 1.0, %v1736_v3  ;;  %v1257_v33 = vsel %vm515_vm5, 1.0, %v1736_v3 }
  0xb5   : > { %vm562_vm9 = vcmp.eq.s32.totalorder %v2010_v2, %v561_v17  ;;  %vm563_vm10 = vcmp.eq.s32.totalorder %v2015_v4, %v561_v17  ;;  %vm610_vm3 = vcmp.eq.s32.totalorder %v2010_v2, %v609_v7  ;;  %v1436_v34 = vpack.c.bf16 %v697_v30, %v696_v11 }
  0xb6   : > { %v520_v41 = vadd.f32 %v1256_v15, %v472_v14  ;;  %v521_v42 = vadd.f32 %v1257_v33, %v473_v31  ;;  %v1266_v43 = vsel %vm562_vm9, 1.0, %v1736_v3  ;;  %v1267_v44 = vsel %vm563_vm10, 1.0, %v1736_v3 }
  0xb7   : > { %vm611_vm4 = vcmp.eq.s32.totalorder %v2015_v4, %v609_v7  ;;  %v1276_v35 = vsel %vm610_vm3, 1.0, %v1736_v3  ;;  %vm658_vm11 = vcmp.eq.s32.totalorder %v2010_v2, %v657_v24  ;;  %1437 = vmatpush3.bf16.msra.mxu1 %v1436_v34  ;;  %vm659_vm12 = vcmp.eq.s32.totalorder %v2015_v4, %v657_v24 }
  0xb8   : > { %v568_v36 = vadd.f32 %v1266_v43, %v520_v41  ;;  %v569_v45 = vadd.f32 %v1267_v44, %v521_v42  ;;  %v1277_v46 = vsel %vm611_vm4, 1.0, %v1736_v3  ;;  %v1286_v47 = vsel %vm658_vm11, 1.0, %v1736_v3  ;;  %1438 = vmatprep.subr.bf16.mxu1 %v1734_v1 }
  0xb9   : > { %v1287_v48 = vsel %vm659_vm12, 1.0, %v1736_v3  ;;  %v705_v49 = vrot.slane %v2039_v18, %v668_v59  ;;  %vm338_vm13 = vcmp.eq.s32.totalorder %v2025_v8, %v2050_v23  ;;  %vm339_vm14 = vcmp.eq.s32.totalorder %v2028_v9, %v2050_v23 }
  0xba   : > { %v616_v50 = vadd.f32 %v1276_v35, %v568_v36  ;;  %v617_v52 = vadd.f32 %v1277_v46, %v569_v45  ;;  %v1222_v53 = vsel %vm338_vm13, 1.0, %v1736_v3  ;;  %v1223_v54 = vsel %vm339_vm14, 1.0, %v1736_v3 }
  0xbb   : > { %vm706_vm7 = vcmp.eq.s32.totalorder %v2010_v2, %v705_v49  ;;  %vm707_vm8 = vcmp.eq.s32.totalorder %v2015_v4, %v705_v49  ;;  %vm386_vm15 = vcmp.eq.s32.totalorder %v2025_v8, %v2056_v26  ;;  %vm387_vm2 = vcmp.eq.s32.totalorder %v2028_v9, %v2056_v26 }
  0xbc   : > { %v664_v18 = vadd.f32 %v1286_v47, %v616_v50  ;;  %v665_v59 = vadd.f32 %v1287_v48, %v617_v52  ;;  %v1296_v55 = vsel %vm706_vm7, 1.0, %v1736_v3  ;;  %v1297_v56 = vsel %vm707_vm8, 1.0, %v1736_v3 }
  0xbd   : > { %v1232_v57 = vsel %vm386_vm15, 1.0, %v1736_v3  ;;  %vm434_vm5 = vcmp.eq.s32.totalorder %v2025_v8, %v2062_v28  ;;  %vm435_vm9 = vcmp.eq.s32.totalorder %v2028_v9, %v2062_v28  ;;  %v1233_v58 = vsel %vm387_vm2, 1.0, %v1736_v3 }
  0xbe   : > { %v712_v2 = vadd.f32 %v1296_v55, %v664_v18  ;;  %v713_v4 = vadd.f32 %v1297_v56, %v665_v59  ;;  %v410_v61 = vadd.f32 %v1232_v57, %v1222_v53  ;;  %v411_v62 = vadd.f32 %v1233_v58, %v1223_v54 }
  0xbf   : > { %v1242_v63 = vsel %vm434_vm5, 1.0, %v1736_v3  ;;  %v1243_v0 = vsel %vm435_vm9, 1.0, %v1736_v3  ;;  %vm482_vm10 = vcmp.eq.s32.totalorder %v2025_v8, %v2067_v29  ;;  %vm483_vm3 = vcmp.eq.s32.totalorder %v2028_v9, %v2067_v29 }
  0xc0   : > { %v1444_v10 = vpack.c.bf16 %v713_v4, %v712_v2  ;;  %v458_v16 = vadd.f32 %v1242_v63, %v410_v61  ;;  %v1252_v21 = vsel %vm482_vm10, 1.0, %v1736_v3  ;;  %v459_v22 = vadd.f32 %v1243_v0, %v411_v62 }
  0xc1   : > { %v1253_v6 = vsel %vm483_vm3, 1.0, %v1736_v3  ;;  %vm530_vm4 = vcmp.eq.s32.totalorder %v2025_v8, %v2102_v37  ;;  %vm531_vm11 = vcmp.eq.s32.totalorder %v2028_v9, %v2102_v37  ;;  %vm578_vm12 = vcmp.eq.s32.totalorder %v2025_v8, %v2107_v38 }
  0xc2   : > { %1445 = vmatprep.subr.bf16.mxu0 %v1444_v10  ;;  %v506_v25 = vadd.f32 %v1252_v21, %v458_v16  ;;  %v1262_v17 = vsel %vm530_vm4, 1.0, %v1736_v3  ;;  %v1263_v7 = vsel %vm531_vm11, 1.0, %v1736_v3  ;;  %v507_v24 = vadd.f32 %v1253_v6, %v459_v22 }
  0xc3   : > { %1447 = vmatpush3.bf16.msra.mxu0 %v1444_v10  ;;  %vm579_vm13 = vcmp.eq.s32.totalorder %v2028_v9, %v2107_v38  ;;  %v1272_v27 = vsel %vm578_vm12, 1.0, %v1736_v3  ;;  %vm626_vm14 = vcmp.eq.s32.totalorder %v2025_v8, %v2116_v39  ;;  %vm627_vm7 = vcmp.eq.s32.totalorder %v2028_v9, %v2116_v39 }
  0xc4   : > { %v554_v11 = vadd.f32 %v1262_v17, %v506_v25  ;;  %v1273_v12 = vsel %vm579_vm13, 1.0, %v1736_v3  ;;  %v1282_v13 = vsel %vm626_vm14, 1.0, %v1736_v3  ;;  %v555_v30 = vadd.f32 %v1263_v7, %v507_v24 }
  0xc5   : > { %v1283_v14 = vsel %vm627_vm7, 1.0, %v1736_v3  ;;  %vm674_vm8 = vcmp.eq.s32.totalorder %v2025_v8, %v2196_v5  ;;  %vm675_vm15 = vcmp.eq.s32.totalorder %v2028_v9, %v2196_v5  ;;  %vm340_vm2 = vcmp.eq.s32.totalorder %v2042_v19, %v2050_v23 }
  0xc6   : > { %v602_v31 = vadd.f32 %v1272_v27, %v554_v11  ;;  %v1292_v15 = vsel %vm674_vm8, 1.0, %v1736_v3  ;;  %v1293_v33 = vsel %vm675_vm15, 1.0, %v1736_v3  ;;  %1414 = vmatmul.mubr.msk.f32.vlgmr.msra.gmra.mrb[6].mxu0 %vm809_vm1, %v2127_v40  ;;  %v603_v34 = vadd.f32 %v1273_v12, %v555_v30 }
  0xc7   : > { %vm341_vm5 = vcmp.eq.s32.totalorder %v2045_v20, %v2050_v23  ;;  %v1224_v8 = vsel %vm340_vm2, 1.0, %v1736_v3  ;;  %vm388_vm9 = vcmp.eq.s32.totalorder %v2042_v19, %v2056_v26  ;;  %vm389_vm10 = vcmp.eq.s32.totalorder %v2045_v20, %v2056_v26 }
  0xc8   : > { %v650_v9 = vadd.f32 %v1282_v13, %v602_v31  ;;  %v1225_v41 = vsel %vm341_vm5, 1.0, %v1736_v3  ;;  %v1234_v40 = vsel %vm388_vm9, 1.0, %v1736_v3  ;;  %v651_v42 = vadd.f32 %v1283_v14, %v603_v34 }
  0xc9   : > { %v1235_v43 = vsel %vm389_vm10, 1.0, %v1736_v3  ;;  %v412_v44 = vadd.f32 %v1234_v40, %v1224_v8  ;;  %vm436_vm1 = vcmp.eq.s32.totalorder %v2042_v19, %v2062_v28  ;;  %vm437_vm3 = vcmp.eq.s32.totalorder %v2045_v20, %v2062_v28 }
  0xca   : > { %v698_v23 = vadd.f32 %v1292_v15, %v650_v9  ;;  %v413_v35 = vadd.f32 %v1235_v43, %v1225_v41  ;;  %v1244_v36 = vsel %vm436_vm1, 1.0, %v1736_v3  ;;  %v699_v45 = vadd.f32 %v1293_v33, %v651_v42 }
  0xcb   : > { %v1245_v46 = vsel %vm437_vm3, 1.0, %v1736_v3  ;;  %v460_v26 = vadd.f32 %v1244_v36, %v412_v44  ;;  %vm484_vm4 = vcmp.eq.s32.totalorder %v2042_v19, %v2067_v29  ;;  %vm485_vm11 = vcmp.eq.s32.totalorder %v2045_v20, %v2067_v29 }
  0xcc   : > { %v461_v47 = vadd.f32 %v1245_v46, %v413_v35  ;;  %v1254_v48 = vsel %vm484_vm4, 1.0, %v1736_v3  ;;  %vm532_vm12 = vcmp.eq.s32.totalorder %v2042_v19, %v2102_v37  ;;  %v1439_v49 = vpack.c.bf16 %v699_v45, %v698_v23 }
  0xcd   : > { %v1255_v28 = vsel %vm485_vm11, 1.0, %v1736_v3  ;;  %v508_v50 = vadd.f32 %v1254_v48, %v460_v26  ;;  %vm533_vm13 = vcmp.eq.s32.totalorder %v2045_v20, %v2102_v37  ;;  %v1264_v53 = vsel %vm532_vm12, 1.0, %v1736_v3 }
  0xce   : > { %v509_v52 = vadd.f32 %v1255_v28, %v461_v47  ;;  %v1265_v54 = vsel %vm533_vm13, 1.0, %v1736_v3  ;;  %vm580_vm14 = vcmp.eq.s32.totalorder %v2042_v19, %v2107_v38  ;;  %1440 = vmatpush3.bf16.msra.mxu1 %v1439_v49  ;;  %vm581_vm7 = vcmp.eq.s32.totalorder %v2045_v20, %v2107_v38 }
  0xcf   : > { %v556_v29 = vadd.f32 %v1264_v53, %v508_v50  ;;  %v1274_v18 = vsel %vm580_vm14, 1.0, %v1736_v3  ;;  %vm628_vm8 = vcmp.eq.s32.totalorder %v2042_v19, %v2116_v39  ;;  %1441 = vmatprep.subr.bf16.mxu1 %v1734_v1  ;;  %v1275_v59 = vsel %vm581_vm7, 1.0, %v1736_v3 }
  0xd0   : > { %v557_v37 = vadd.f32 %v1265_v54, %v509_v52  ;;  %vm629_vm15 = vcmp.eq.s32.totalorder %v2045_v20, %v2116_v39  ;;  %v1284_v55 = vsel %vm628_vm8, 1.0, %v1736_v3  ;;  %vm676_vm2 = vcmp.eq.s32.totalorder %v2042_v19, %v2196_v5 }
  0xd1   : > { %v604_v56 = vadd.f32 %v1274_v18, %v556_v29  ;;  %v1285_v57 = vsel %vm629_vm15, 1.0, %v1736_v3  ;;  %vm677_vm5 = vcmp.eq.s32.totalorder %v2045_v20, %v2196_v5  ;;  %v1294_v1 = vsel %vm676_vm2, 1.0, %v1736_v3 }
  0xd2   : > { %v605_v38 = vadd.f32 %v1275_v59, %v557_v37  ;;  %v1295_v4 = vsel %vm677_vm5, 1.0, %v1736_v3 }
  0xd3   : > { %v652_v2 = vadd.f32 %v1284_v55, %v604_v56 }
  0xd4   : > { %v653_v58 = vadd.f32 %v1285_v57, %v605_v38 }
  0xd5   : > { %v700_v61 = vadd.f32 %v1294_v1, %v652_v2 }
  0xd6   : > { %v701_v39 = vadd.f32 %v1295_v4, %v653_v58 }
  0xd8   : > { %v1442_v62 = vpack.c.bf16 %v701_v39, %v700_v61 }
  0xda   : > { %1443 = vmatpush3.bf16.msra.mxu1 %v1442_v62 }
  0xdd   : > { %1401 = vmatmul.mubr.msk.f32.vlgmr.msra.gmra.mrb[2].mxu1 %vm719_vm6, %v2189_v60 }
  0xde   : > { %1403 = vmatprep.mubr.msk.f32.mxu1 %vm1735_vm0, %v1736_v3 }
  0xe1   : > { %1404 = vmatmul.mubr.msk.f32.gmra.mrb[4].mxu1 %vm719_vm6, %v2219_v32 }
  0xe2   : > { %1406 = vmatprep.mubr.msk.f32.mxu1 %vm1735_vm0, %v1736_v3 }
  0xe5   : > { %1407 = vmatmul.mubr.msk.f32.gmra.mrb[6].mxu1 %vm719_vm6, %v2238_v51 }
 0x16e   : > { %v1383_v19 = vpop.f32.mrb[0].mxu1 }
 0x16f   : > { %v882_v20 = vpop.f32.mrb[1].mxu1 }
 0x177   : > { %v795_v5 = vpop.f32.mrb[0].mxu0 }
 0x178   : > { %v1370_v63 = vpop.f32.mrb[1].mxu0 }
 0x17b   : > { %v800_v0 = vpop.f32.mrb[2].mxu0 }
 0x17c   : > { %v1373_v10 = vpop.f32.mrb[3].mxu0 }
 0x17f   : > { %v805_v16 = vpop.f32.mrb[4].mxu0 }
 0x180   : > { %v1376_v60 = vpop.f32.mrb[5].mxu0 }
 0x199   : > { %v1415_v21 = vpop.f32.mrb[6].mxu0 }
 0x19a   : > { %v1055_v22 = vmul.f32 %v1415_v21, %v1383_v19  ;;  %v1036_v6 = vpop.f32.mrb[7].mxu0 }
 0x19b   : > { %v1054_v25 = vmul.f32 %v1036_v6, %v882_v20 }
 0x19d   : > { %v1056_v17 = vadd.f32 %v1055_v22, %v1054_v25 }
 0x19f   : > { %v1057_v32 = vrot.slane %v1056_v17, 4 }
 0x1a1   : > { %v1058_v27 = vadd.f32 %v1057_v32, %v1056_v17 }
 0x1a3   : > { %v1059_v13 = vrot.slane %v1058_v27, 2 }
 0x1a5   : > { %v1060_v33 = vadd.f32 %v1059_v13, %v1058_v27 }
 0x1a7   : > { %v1061_v9 = vrot.slane %v1060_v33, 1 }
 0x1a9   : > { %v1062_v42 = vadd.f32 %v1061_v9, %v1060_v33 }
 0x1b0   : > { %v957_v7 = vpop.f32.mrb[2].mxu1 }
 0x1b1   : > { %v1045_v24 = vmul.f32 %v957_v7, %v795_v5  ;;  %v1402_v3 = vpop.f32.mrb[3].mxu1 }
 0x1b4   : > { %v962_v11 = vpop.f32.mrb[4].mxu1 }
 0x1b5   : > { %v1046_v51 = vmul.f32 %v962_v11, %v800_v0  ;;  %v1405_v12 = vpop.f32.mrb[5].mxu1 }
 0x1b7   : > { %v1047_v30 = vadd.f32 %v1046_v51, %v1045_v24 }
 0x1b8   : > { %v967_v14 = vpop.f32.mrb[6].mxu1 }
 0x1b9   : > { %v1048_v31 = vrot.slane %v1047_v30, 4  ;;  %v1408_v15 = vpop.f32.mrb[7].mxu1 }
 0x1bb   : > { %v1049_v34 = vadd.f32 %v1048_v31, %v1047_v30 }
 0x1bd   : > { %v1050_v8 = vrot.slane %v1049_v34, 2 }
 0x1bf   : > { %v1051_v41 = vadd.f32 %v1050_v8, %v1049_v34 }
 0x1c1   : > { %v1052_v40 = vrot.slane %v1051_v41, 1 }
 0x1c3   : > { %v1053_v43 = vadd.f32 %v1052_v40, %v1051_v41 }
 0x1c5   : > { %v1063_v44 = vadd.f32 %v1062_v42, %v1053_v43 }
 0x1c7   : > { %v1064_v23 = vmul.f32 0.125, %v1063_v44 }
 0x1c9   : > { %v1065_v35 = vadd.f32 %v1064_v23, %v805_v16 }
 0x1cb   : > { %v1318_v36 = vmul.f32 -1.442695, %v1065_v35 }
 0x1cd   : > { %1527 = vpow2.f32 %v1318_v36 }
 0x1d7   : > { %v1528_v45 = vpop.eup %1527 }
 0x1d8   : > { %v1069_v46 = vadd.f32 1.0, %v1528_v45 }
 0x1da   : > { %1529 = vrcp.f32 %v1069_v46 }
 0x1e4   : > { %v1530_v26 = vpop.eup %1529 }
 0x1e5   : > { %1072 = vst [vmem:[%s279_s29] sm:$0x1] %v1530_v26 }
 0x1e6   : > { %1660 = shalt.err (!%p1657_p7)
}
 0x1e7   : > { %s1661_s30 = scalar_lea.hbm %s2428_s28, 16  ;;  %s1665_s23 = scalar_lea.hbm %s2476_s4, 32 }
 0x1e8   : > { %p1662_p9 = scmp.ne.s32.totalorder %s2428_s28, %s1661_s30  ;;  %p1666_p11 = scmp.lt.u32.totalorder %s2428_s28, %s2476_s4 }
 0x1e9   : > { %p1667_p2 = scmp.lt.u32.totalorder %s1665_s23, %s1661_s30  ;;  %p1669_p1 = scmp.lt.u32.totalorder %s1661_s30, %s2428_s28 }
 0x1ea   : > { %p1663_p0 = pnand %p1662_p9, %p2496_p13 }
 0x1eb   : > { %p1668_p12 = por %p1667_p2, %p1666_p11 }
 0x1ec   : > { %p1664_p8 = pneg %p1663_p0 }
 0x1ed   : > { %p1670_p6 = por %p1669_p1, %p1668_p12 }
 0x1ef   : > { %p1671_p10 = pnand %p1670_p6, %p1664_p8 }
 0x1f1   : > { %1674 = shalt.err (!%p1671_p10)
}
 0x1f2   : > { %1460 = dma.vmem_to_hbm [thread:$0]  (%p2496_p13), %s2430_s8, 16, %s2428_s28, %s1074_s12  }
 0x1f3 PF: > { %s1098_s24 = sand.u32 1, %s1713_s15   ;;  %p2497_p4 = scmp.ne.s32.totalorder %s2483_s22, 0 }
 0x1f4   : > { %p2498_p5 = scmp.ge.s32.totalorder %s1725_s18, 2  ;;  %s1099_s21 = scalar_lea.sflag [#allocation4], %s1098_s24 }
 0x1f6   : > { %p1477_p3 = pnand %p2498_p5, %p2497_p4 }
 0x1f8   : > { %1708 = dma.done.wait (!%p1477_p3), %s1099_s21, 16  }
 0x1f9   : > { %1710 = vsyncadd (!%p1477_p3), %s1099_s21, 4294967280  ;;  %p21_p7 = scmp.ge.s32.totalorder %s1880_s26, 4   ;;  %s2499_s15 = smov %s1717_s16 }
 0x1fa   : > { %s2500_s16 = smov %s1721_s17  ;;  %s2501_s17 = smov %s1896_s14 }
 0x1fb   : > { %s2502_s18 = smov %s1880_s26  ;;  %23 = sbr.rel (!%p21_p7) target bundleno = 8 (0x8), region = 102 }
 0x202   :  { %1103 = vsyncpa [#allocation3], 1 }
 0x203   :  { %1105 = vsyncpa [#allocation3 + $0x1], 1 }
 0x204   :  { %1106 = vsyncpa [#allocation6], 1 }
 0x205   :  { %1108 = vsyncpa [#allocation6 + $0x1], 1 }
 0x206   :  { %1109 = vsyncpa [#allocation9], 1 }
 0x207   :  { %1110 = vsyncpa [#allocation4], 1 }
 0x208   :  { %1112 = vsyncpa [#allocation4 + $0x1], 1 }

</bundles_post_ra>
